<compile_context>
chip_gen: v5e
topology: v5e:2x2
jax: 0.10.0
libtpu: 0.0.40
codegen_flags: <defaults>
</compile_context>

<pallas_src>
import jax
import jax.numpy as jnp
from jax.experimental import pallas as pl
from jax.experimental.pallas import tpu as pltpu

OUT_PAD = 8  # padded output width (real outputs live in cols 0:2)


def _fused_linear_kernel(x2_ref, w_ref, b_ref, o_ref):
    # Single fused linear: (TB, 32) @ (32, 8) + (1, 8) -> (TB, 8)
    y = jnp.dot(x2_ref[...], w_ref[...], preferred_element_type=jnp.float32)
    o_ref[...] = (y + b_ref[...]).astype(o_ref.dtype)


def _round_up(n, m):
    return ((n + m - 1) // m) * m


def model_forward(x2, x, fused_params, *, tb=2048, min_pallas_batch=256,
                  force_pallas=False):
    """Reproduces Model.forward(x2, x): returns fc1(fc2(x2)); `x` is unused."""
    del x  # unused by the PyTorch forward
    w_fused, b_fused = fused_params          # (32, OUT_PAD), (1, OUT_PAD)
    B, K = x2.shape

    # Small-batch fast path: a single fused XLA dot beats the fixed Pallas
    # dispatch overhead until B is large enough to be HBM-streaming bound.
    if B < min_pallas_batch and not force_pallas:
        return x2 @ w_fused[:, :2] + b_fused[0, :2]

    # Batch tile: multiple of 8 sublanes, capped so the grid has >= 2 steps
    # (lets "parallel" shard across both TensorCores on v7x; harmless on
    # v5e/v6e where there is a single TC).
    tb8 = max(8, (tb // 8) * 8)
    TB = min(tb8, max(8, _round_up(pl.cdiv(B, 2), 8)))
    grid = (pl.cdiv(B, TB),)   # ragged last block handled by Pallas masking

    out_padded = pl.pallas_call(
        _fused_linear_kernel,
        out_shape=jax.ShapeDtypeStruct((B, OUT_PAD), x2.dtype),
        grid=grid,
        in_specs=[
            pl.BlockSpec((TB, K), lambda i: (i, 0)),         # x2 tile, streamed
            pl.BlockSpec((K, OUT_PAD), lambda i: (0, 0)),    # fused weight, resident
            pl.BlockSpec((1, OUT_PAD), lambda i: (0, 0)),    # fused bias, resident
        ],
        out_specs=pl.BlockSpec((TB, OUT_PAD), lambda i: (i, 0)),
        compiler_params=pltpu.CompilerParams(
            dimension_semantics=("parallel",)),              # megacore on v7x
    )(x2, w_fused, b_fused)

    # Strip the lane padding (real output width is 2).
    return out_padded[:, :2]


def init_params(key):
    """PyTorch-Linear-style init, then host-side fusion + lane padding."""
    k1, k2, k3, k4 = jax.random.split(key, 4)
    # fc2: Linear(32, 2) -> weight (2, 32), bias (2,)
    bound2 = 1.0 / jnp.sqrt(32.0)
    w2 = jax.random.uniform(k1, (2, 32), jnp.float32, -bound2, bound2)
    b2 = jax.random.uniform(k2, (2,), jnp.float32, -bound2, bound2)
    # fc1: Linear(2, 2) -> weight (2, 2), bias (2,)
    bound1 = 1.0 / jnp.sqrt(2.0)
    w1 = jax.random.uniform(k3, (2, 2), jnp.float32, -bound1, bound1)
    b1 = jax.random.uniform(k4, (2,), jnp.float32, -bound1, bound1)

    # Fuse: y = (x @ w2.T + b2) @ w1.T + b1 = x @ (w2.T @ w1.T) + (b2 @ w1.T + b1)
    w_fused = w2.T @ w1.T          # (32, 2)
    b_fused = b2 @ w1.T + b1       # (2,)

    # Zero-pad output dim to OUT_PAD (=8) so block last dim == array last dim.
    w_pad = jnp.zeros((32, OUT_PAD), jnp.float32).at[:, :2].set(w_fused)
    b_pad = jnp.zeros((1, OUT_PAD), jnp.float32).at[0, :2].set(b_fused)

    fused = (w_pad, b_pad)
    raw = (w2, b2, w1, b1)
    return fused, raw


def _reference(x2, raw_params):
    w2, b2, w1, b1 = raw_params
    return (x2 @ w2.T + b2) @ w1.T + b1


if __name__ == "__main__":
    key = jax.random.PRNGKey(0)
    kx2, kx, kp, kbig = jax.random.split(key, 4)

    fused_params, raw_params = init_params(kp)

    # Spec-sized inputs (batch=2).
    x2 = jax.random.normal(kx2, (2, 32), jnp.float32)   # input to fc2
    x = jax.random.normal(kx, (2, 2), jnp.float32)      # unused, signature parity

    # 1) Default path for tiny batch (fast XLA path).
    out_fast = model_forward(x2, x, fused_params)
    jax.block_until_ready(out_fast)

    # 2) Force the Pallas kernel on the same inputs (exercises ragged block).
    out_pallas = model_forward(x2, x, fused_params, force_pallas=True)
    jax.block_until_ready(out_pallas)

    ref_small = _reference(x2, raw_params)
    assert out_fast.shape == (2, 2), f"bad output shape {out_fast.shape}"
    assert out_pallas.shape == (2, 2), f"bad output shape {out_pallas.shape}"
    assert jnp.allclose(out_fast, ref_small, atol=1e-5, rtol=1e-5), "fast-path mismatch"
    assert jnp.allclose(out_pallas, ref_small, atol=1e-5, rtol=1e-5), "pallas mismatch"

    # 3) Medium batch hitting the natural Pallas path with a 2-step grid and a
    #    ragged last block (B=270, TB=136 -> blocks of 136 and 134 rows).
    x2_big = jax.random.normal(kbig, (270, 32), jnp.float32)
    out_big = model_forward(x2_big, None, fused_params)
    jax.block_until_ready(out_big)
    ref_big = _reference(x2_big, raw_params)
    assert out_big.shape == (270, 2), f"bad output shape {out_big.shape}"
    assert jnp.allclose(out_big, ref_big, atol=1e-5, rtol=1e-5), "big-batch mismatch"

    print("KERNEL_OK")
</pallas_src>

<mosaic_0001>
module attributes {stable_mosaic.version = 11 : i64} {
  func.func @_fused_linear_kernel(%arg0: i32, %arg1: memref<8x32xf32, #tpu.memory_space<vmem>>, %arg2: memref<32x8xf32, #tpu.memory_space<vmem>>, %arg3: memref<1x8xf32, #tpu.memory_space<vmem>>, %arg4: memref<8x8xf32, #tpu.memory_space<vmem>>) attributes {dimension_semantics = [#tpu.dimension_semantics<parallel>], iteration_bounds = array<i64: 1>, scalar_prefetch = 0 : i64, scratch_operands = 0 : i64, tpu.core_type = #tpu.core_type<tc>, window_params = [{transform_indices = @transform_0, window_bounds = array<i64: 8, 32>}, {pipeline_mode = #tpu.pipeline_mode<synchronous>, transform_indices = @transform_1, window_bounds = array<i64: 32, 8>}, {pipeline_mode = #tpu.pipeline_mode<synchronous>, transform_indices = @transform_2, window_bounds = array<i64: 1, 8>}, {transform_indices = @transform_3, window_bounds = array<i64: 8, 8>}]} {
    %c0 = arith.constant 0 : index
    %c0_0 = arith.constant 0 : index
    %0 = vector.load %arg1[%c0, %c0_0] : memref<8x32xf32, #tpu.memory_space<vmem>>, vector<8x32xf32>
    %c0_1 = arith.constant 0 : index
    %c0_2 = arith.constant 0 : index
    %1 = vector.load %arg2[%c0_1, %c0_2] : memref<32x8xf32, #tpu.memory_space<vmem>>, vector<32x8xf32>
    %cst = arith.constant dense<0.000000e+00> : vector<8x8xf32>
    %2 = tpu.matmul %0, %1, %cst {dimension_numbers = #tpu.dot_dimension_numbers<[1], [0], [0], [1], [0, 0, 1, 1], [], []>} : vector<8x32xf32>, vector<32x8xf32>, vector<8x8xf32> -> vector<8x8xf32>
    %c0_3 = arith.constant 0 : index
    %c0_4 = arith.constant 0 : index
    %3 = vector.load %arg3[%c0_3, %c0_4] : memref<1x8xf32, #tpu.memory_space<vmem>>, vector<1x8xf32>
    %4 = vector.broadcast %3 : vector<1x8xf32> to vector<8x8xf32>
    %5 = arith.addf %2, %4 : vector<8x8xf32>
    %c0_5 = arith.constant 0 : index
    %c0_6 = arith.constant 0 : index
    %6 = vector.load %arg4[%c0_5, %c0_6] : memref<8x8xf32, #tpu.memory_space<vmem>>, vector<8x8xf32>
    tpu.vector_store %arg4[%c0_5, %c0_6], %5 {strides = array<i32>} : memref<8x8xf32, #tpu.memory_space<vmem>>, vector<8x8xf32>,
    return
  }
  func.func @transform_0(%arg0: i32) -> (i32, i32) {
    %c0_i32 = arith.constant 0 : i32
    %c0_i32_0 = arith.constant 0 : i32
    return %arg0, %c0_i32 : i32, i32
  }
  func.func @transform_1(%arg0: i32) -> (i32, i32) {
    %c0_i32 = arith.constant 0 : i32
    %c0_i32_0 = arith.constant 0 : i32
    %c0_i32_1 = arith.constant 0 : i32
    return %c0_i32, %c0_i32_0 : i32, i32
  }
  func.func @transform_2(%arg0: i32) -> (i32, i32) {
    %c0_i32 = arith.constant 0 : i32
    %c0_i32_0 = arith.constant 0 : i32
    %c0_i32_1 = arith.constant 0 : i32
    return %c0_i32, %c0_i32_0 : i32, i32
  }
  func.func @transform_3(%arg0: i32) -> (i32, i32) {
    %c0_i32 = arith.constant 0 : i32
    %c0_i32_0 = arith.constant 0 : i32
    return %arg0, %c0_i32 : i32, i32
  }
}

</mosaic_0001>

<bundles_post_ra>
// kernel: tpu_custom_call.1
= control target key start
LH: loop header
LB: loop body
LE: loop exit
PB: predicated region body
PF: predicated region fallthrough
CT: control target
= control target key end

     0   :  { %8 = vsyncpa [#allocation3], 0  ;;  %vm24_vm0 = vcmask 261120   ;;  %vm48_vm1 = vcmask 64512   ;;  %s143_s0 = inlined_call_operand.vmem [shape: f32[2,32], index: 0, kind: input, shape index: {}]   ;;  %s144_s1 = inlined_call_operand.vmem [shape: f32[32,8], index: 1, kind: input, shape index: {}]   ;;  %s145_s2 = inlined_call_operand.vmem [shape: f32[1,8], index: 2, kind: input, shape index: {}]   ;;  %s146_s3 = inlined_call_operand.hbm [shape: f32[2,8], index: 3, kind: output, shape index: {}]  }
   0x1   :  { %v19_v0 = vld [vmem:[%s144_s1 + $0x18] sm:$0xff]  ;;  %v18_v1 = vld [vmem:[%s144_s1 + $0x10] sm:$0xff]  ;;  %v17_v2 = vld [vmem:[%s144_s1 + $0x8] sm:$0xff] }
   0x2   :  { %40 = vmatpush.msra.mxu0 %v19_v0  ;;  %v16_v3 = vld [vmem:[%s144_s1] sm:$0xff] }
   0x3   :  { %v15_v4 = vld [vmem:[%s143_s0] sm:$0xff] }
   0x4   :  { %41 = vmatpush.msra.mxu0 %v18_v1  ;;  %v72_v5 = vld [vmem:[%s145_s2] ss:$0 sm:$0xff] }
   0x6   :  { %42 = vmatpush.msra.mxu0 %v17_v2 }
   0x8   :  { %43 = vmatpush.msra.mxu0 %v16_v3 }
   0x9   :  { %68 = vmatmul.msk.f32.vlgmr.msra.gmra.mxu0 %vm24_vm0, %v15_v4 }
  0x86   :  { %v45_v6 = vpop.f32.mrf.mxu0 }
  0x87   :  { %v46_v7 = vadd.f32 %v72_v5, %v45_v6 }
  0x89   :  { %49 = vst.msk [vmem:[#allocation2] sm:$0xff] %vm48_vm1, %v46_v7 }
  0x8a   :  { %53 = vsyncadd [#allocation3], 96  ;;  %s56_s1 = sshll.u32 %s146_s3, 4  ;;  %s99_s26 = smov [#allocation2]   ;;  %s57_s1 = int_to_ptr.hbm [resolvable:$true] %s56_s1 }
  0x8b   :  { %s54_s27 = sshll.u32 %s99_s26, 4  ;;  %s100_s0 = smov 32   ;;  %s55_s27 = int_to_ptr.vmem [resolvable:$true] %s54_s27 }
  0x8c   :  { %s101_s28 = smov 2  }
  0x8d   :  { %62 = dma.vmem_to_hbm [thread:$0]  %s55_s27, 32, %s57_s1, [#allocation3], %s100_s0, %s100_s0, %s101_s28  }
  0x8e   :  { %97 = dma.done.wait [#allocation3], 128  }
  0x8f   :  { %98 = vsyncadd [#allocation3], 4294967168 }
  0x90   :  { %67 = vsyncpa [#allocation3], 1 }

</bundles_post_ra>
